<compile_context>
chip_gen: v6e
topology: v6e:2x2x1
jax: 0.10.0
libtpu: 0.0.40
codegen_flags: <defaults>
</compile_context>

<pallas_src>
import jax
import jax.numpy as jnp
from jax.experimental import pallas as pl
from jax.experimental.pallas import tpu as pltpu


IN_FEATURES = 4
OUT_FEATURES = 4


def _linear_kernel(w_ref, b_ref, x_ref, o_ref):
    # w_ref: [OUT, IN]      (constant index map -> stays resident in VMEM)
    # b_ref: [OUT, 1]       (constant index map -> stays resident in VMEM)
    # x_ref: [IN,  TILE_N]  features on sublanes, tokens on lanes (lane-dense)
    # o_ref: [OUT, TILE_N]  lane-dense output -> unmasked vector stores
    x = x_ref[...]
    w = w_ref[...]

    # y[o, t] = sum_i w[o, i] * x[i, t] + b[o]
    # 4 x (lane-broadcast coeff * sublane-broadcast row) FMAs on the VPU;
    # no MXU, no in-kernel transpose.
    acc = w[:, 0:1] * x[0:1, :]
    for i in range(1, IN_FEATURES):
        acc = acc + w[:, i : i + 1] * x[i : i + 1, :]
    acc = acc + b_ref[...]

    o_ref[...] = acc.astype(o_ref.dtype)


def linear_pallas(x, weight, bias, *, tile_n=512):
    """y = x @ weight.T + bias applied over the last axis of x (PyTorch Linear)."""
    assert tile_n % 128 == 0, "lane tile must be a multiple of 128"
    orig_shape = x.shape
    in_f = orig_shape[-1]
    out_f, w_in = weight.shape
    assert in_f == w_in == IN_FEATURES and out_f == OUT_FEATURES

    # Flatten tokens and go feature-major so the long token axis sits on lanes.
    # (Wrapper-side transpose/pad is layout plumbing; XLA handles it.)
    x2d = x.reshape(-1, in_f)
    n = x2d.shape[0]
    n_pad = ((n + tile_n - 1) // tile_n) * tile_n
    xt = jnp.pad(x2d.T, ((0, 0), (0, n_pad - n)))          # [in_f, n_pad]
    b2d = bias.reshape(out_f, 1)                            # [out_f, 1]

    grid = (n_pad // tile_n,)

    yt = pl.pallas_call(
        _linear_kernel,
        out_shape=jax.ShapeDtypeStruct((out_f, n_pad), x.dtype),
        grid_spec=pltpu.PrefetchScalarGridSpec(
            num_scalar_prefetch=0,
            grid=grid,
            in_specs=[
                # Weight / bias: full tiny blocks, constant block index ->
                # resident across the whole grid (no re-DMA per step).
                pl.BlockSpec((out_f, in_f), lambda i: (0, 0)),
                pl.BlockSpec((out_f, 1), lambda i: (0, 0)),
                # Activations: tile the token/lane axis.
                pl.BlockSpec((in_f, tile_n), lambda i: (0, i)),
            ],
            out_specs=pl.BlockSpec((out_f, tile_n), lambda i: (0, i)),
        ),
        compiler_params=pltpu.CompilerParams(
            # Independent token tiles -> shard across TensorCores on v7x.
            dimension_semantics=("parallel",),
        ),
    )(weight, b2d, xt)

    y2d = yt[:, :n].T                                       # [n, out_f]
    return y2d.reshape(*orig_shape[:-1], out_f)


def init_params(key):
    """Deterministic init mimicking torch.nn.Linear (kaiming-uniform-ish)."""
    k_w, k_b = jax.random.split(key)
    bound = 1.0 / jnp.sqrt(IN_FEATURES)
    weight = jax.random.uniform(
        k_w, (OUT_FEATURES, IN_FEATURES), jnp.float32, -bound, bound
    )
    bias = jax.random.uniform(
        k_b, (OUT_FEATURES,), jnp.float32, -bound, bound
    )
    return weight, bias


if __name__ == "__main__":
    key = jax.random.PRNGKey(0)
    k_x, k_p = jax.random.split(key)

    # Small input consistent with Linear(4, 4): [batch=2, seq=8, features=4]
    x = jax.random.normal(k_x, (2, 8, IN_FEATURES), jnp.float32)
    weight, bias = init_params(k_p)

    y = linear_pallas(x, weight, bias)
    y = jax.block_until_ready(y)

    # Correctness check against plain-JAX reference of the PyTorch forward.
    y_ref = x @ weight.T + bias
    assert y.shape == (2, 8, OUT_FEATURES)
    assert jnp.allclose(y, y_ref, atol=1e-5, rtol=1e-5)

    print("KERNEL_OK")
</pallas_src>

<mosaic_0001>
module attributes {stable_mosaic.version = 11 : i64} {
  func.func @_linear_kernel(%arg0: i32, %arg1: memref<4x4xf32, #tpu.memory_space<vmem>>, %arg2: memref<4x1xf32, #tpu.memory_space<vmem>>, %arg3: memref<4x512xf32, #tpu.memory_space<vmem>>, %arg4: memref<4x512xf32, #tpu.memory_space<vmem>>) attributes {dimension_semantics = [#tpu.dimension_semantics<parallel>], iteration_bounds = array<i64: 1>, scalar_prefetch = 0 : i64, scratch_operands = 0 : i64, tpu.core_type = #tpu.core_type<tc>, window_params = [{pipeline_mode = #tpu.pipeline_mode<synchronous>, transform_indices = @transform_0, window_bounds = array<i64: 4, 4>}, {pipeline_mode = #tpu.pipeline_mode<synchronous>, transform_indices = @transform_1, window_bounds = array<i64: 4, 1>}, {transform_indices = @transform_2, window_bounds = array<i64: 4, 512>}, {transform_indices = @transform_3, window_bounds = array<i64: 4, 512>}]} {
    %c0 = arith.constant 0 : index
    %c0_0 = arith.constant 0 : index
    %0 = vector.load %arg3[%c0, %c0_0] : memref<4x512xf32, #tpu.memory_space<vmem>>, vector<4x512xf32>
    %c0_1 = arith.constant 0 : index
    %c0_2 = arith.constant 0 : index
    %1 = vector.load %arg1[%c0_1, %c0_2] : memref<4x4xf32, #tpu.memory_space<vmem>>, vector<4x4xf32>
    %2 = vector.extract_strided_slice %1 {offsets = [0, 0], sizes = [4, 1], strides = [1, 1]} : vector<4x4xf32> to vector<4x1xf32>
    %3 = vector.extract_strided_slice %0 {offsets = [0, 0], sizes = [1, 512], strides = [1, 1]} : vector<4x512xf32> to vector<1x512xf32>
    %4 = vector.broadcast %2 : vector<4x1xf32> to vector<4x512xf32>
    %5 = vector.broadcast %3 : vector<1x512xf32> to vector<4x512xf32>
    %6 = arith.mulf %4, %5 : vector<4x512xf32>
    %7 = vector.extract_strided_slice %1 {offsets = [0, 1], sizes = [4, 1], strides = [1, 1]} : vector<4x4xf32> to vector<4x1xf32>
    %8 = vector.extract_strided_slice %0 {offsets = [1, 0], sizes = [1, 512], strides = [1, 1]} : vector<4x512xf32> to vector<1x512xf32>
    %9 = vector.broadcast %7 : vector<4x1xf32> to vector<4x512xf32>
    %10 = vector.broadcast %8 : vector<1x512xf32> to vector<4x512xf32>
    %11 = arith.mulf %9, %10 : vector<4x512xf32>
    %12 = arith.addf %6, %11 : vector<4x512xf32>
    %13 = vector.extract_strided_slice %1 {offsets = [0, 2], sizes = [4, 1], strides = [1, 1]} : vector<4x4xf32> to vector<4x1xf32>
    %14 = vector.extract_strided_slice %0 {offsets = [2, 0], sizes = [1, 512], strides = [1, 1]} : vector<4x512xf32> to vector<1x512xf32>
    %15 = vector.broadcast %13 : vector<4x1xf32> to vector<4x512xf32>
    %16 = vector.broadcast %14 : vector<1x512xf32> to vector<4x512xf32>
    %17 = arith.mulf %15, %16 : vector<4x512xf32>
    %18 = arith.addf %12, %17 : vector<4x512xf32>
    %19 = vector.extract_strided_slice %1 {offsets = [0, 3], sizes = [4, 1], strides = [1, 1]} : vector<4x4xf32> to vector<4x1xf32>
    %20 = vector.extract_strided_slice %0 {offsets = [3, 0], sizes = [1, 512], strides = [1, 1]} : vector<4x512xf32> to vector<1x512xf32>
    %21 = vector.broadcast %19 : vector<4x1xf32> to vector<4x512xf32>
    %22 = vector.broadcast %20 : vector<1x512xf32> to vector<4x512xf32>
    %23 = arith.mulf %21, %22 : vector<4x512xf32>
    %24 = arith.addf %18, %23 : vector<4x512xf32>
    %c0_3 = arith.constant 0 : index
    %c0_4 = arith.constant 0 : index
    %25 = vector.load %arg2[%c0_3, %c0_4] : memref<4x1xf32, #tpu.memory_space<vmem>>, vector<4x1xf32>
    %26 = vector.broadcast %25 : vector<4x1xf32> to vector<4x512xf32>
    %27 = arith.addf %24, %26 : vector<4x512xf32>
    %c0_5 = arith.constant 0 : index
    %c0_6 = arith.constant 0 : index
    %28 = vector.load %arg4[%c0_5, %c0_6] : memref<4x512xf32, #tpu.memory_space<vmem>>, vector<4x512xf32>
    tpu.vector_store %arg4[%c0_5, %c0_6], %27 {strides = array<i32>} : memref<4x512xf32, #tpu.memory_space<vmem>>, vector<4x512xf32>,
    return
  }
  func.func @transform_0(%arg0: i32) -> (i32, i32) {
    %c0_i32 = arith.constant 0 : i32
    %c0_i32_0 = arith.constant 0 : i32
    %c0_i32_1 = arith.constant 0 : i32
    return %c0_i32, %c0_i32_0 : i32, i32
  }
  func.func @transform_1(%arg0: i32) -> (i32, i32) {
    %c0_i32 = arith.constant 0 : i32
    %c0_i32_0 = arith.constant 0 : i32
    %c0_i32_1 = arith.constant 0 : i32
    return %c0_i32, %c0_i32_0 : i32, i32
  }
  func.func @transform_2(%arg0: i32) -> (i32, i32) {
    %c0_i32 = arith.constant 0 : i32
    %c0_i32_0 = arith.constant 0 : i32
    return %c0_i32, %arg0 : i32, i32
  }
  func.func @transform_3(%arg0: i32) -> (i32, i32) {
    %c0_i32 = arith.constant 0 : i32
    %c0_i32_0 = arith.constant 0 : i32
    return %c0_i32, %arg0 : i32, i32
  }
}

</mosaic_0001>

<bundles_post_ra>
// kernel: tpu_custom_call.1
= control target key start
LH: loop header
LB: loop body
LE: loop exit
PB: predicated region body
PF: predicated region fallthrough
CT: control target
= control target key end

     0   :  { %8 = vsyncpa [#allocation3], 0  ;;  %s350_s0 = inlined_call_operand.vmem [shape: f32[4,4], index: 0, kind: input, shape index: {}]   ;;  %s351_s1 = inlined_call_operand.vmem [shape: f32[4,1], index: 1, kind: input, shape index: {}]   ;;  %s352_s2 = inlined_call_operand.hbm [shape: f32[4,512], index: 2, kind: input, shape index: {}]   ;;  %s353_s3 = inlined_call_operand.hbm [shape: f32[4,512], index: 3, kind: output, shape index: {}]  }
   0x1   :  { %9 = vsyncpa [#allocation4], 0  ;;  %s312_s12 = smov [#allocation2]  }
   0x2   :  { %s20_s13 = sshll.u32 %s312_s12, 4  ;;  %s21_s13 = int_to_ptr.vmem [resolvable:$true] %s20_s13 }
   0x3   :  { %s276_s14 = scalar_lea.vmem %s21_s13, 256  ;;  %p281_p1 = scmp.lt.s32.totalorder %s21_s13, %s21_s13 }
   0x4   :  { %p277_p0 = scmp.ne.s32.totalorder %s21_s13, %s276_s14  ;;  %p282_p2 = scmp.lt.s32.totalorder %s276_s14, %s276_s14 }
   0x6   :  { %p283_p3 = por %p282_p2, %p281_p1 }
   0x8   :  { %p284_p4 = pnand %p283_p3, %p277_p0 }
   0xa   :  { %287 = shalt.err (!%p284_p4)
}
   0xb   :  { %23 = dma.hbm_to_vmem [thread:$0]  %s352_s2, 256, %s21_s13, [#allocation3]  }
   0xc   :  { %308 = dma.done.wait [#allocation3], 256  }
   0xd   :  { %309 = vsyncadd [#allocation3], 4294967040  ;;  %v313_v0 = vmov 0   ;;  %v314_v1 = vmov 2   ;;  %v29_v2 = vld [vmem:[%s350_s0] sm:$0xf]  ;;  %v37_v6 = vlaneseq }
   0xe   :  { %262 = vset.pattern.permute.xlu0 %v313_v0  ;;  %264 = vset.pattern.permute.xlu1 %v314_v1  ;;  %v315_v3 = vmov 1   ;;  %v316_v4 = vmov 3   ;;  %v221_v5 = vld [vmem:[%s351_s1] sm:$0xf]  ;;  %v28_v11 = vld [vmem:[#allocation2 + $0x8] sm:$0xff]  ;;  %s317_s0 = smov [#allocation5]  }
   0xf   :  { %32 = vperm.xlu0 %262, %v29_v2   ;;  %126 = vperm.xlu1 %264, %v29_v2   ;;  %v38_v7 = vshrl.u32 %v37_v6, 7  ;;  %v27_v10 = vld [vmem:[#allocation2] sm:$0xff]  ;;  %s247_s1 = sshll.u32 %s317_s0, 4  ;;  %s248_s1 = int_to_ptr.vmem [resolvable:$true] %s247_s1 }
  0x10   :  { %s288_s20 = scalar_lea.vmem %s248_s1, 256  ;;  %p293_p6 = scmp.lt.s32.totalorder %s248_s1, %s248_s1 }
  0x11   :  { %v39_v8 = vsub.s32 0, %v38_v7  ;;  %v43_v9 = vsub.s32 4, %v38_v7  ;;  %v131_v12 = vsub.s32 2, %v38_v7  ;;  %v135_v13 = vsub.s32 6, %v38_v7  ;;  %p289_p5 = scmp.ne.s32.totalorder %s248_s1, %s288_s20  ;;  %p294_p7 = scmp.lt.s32.totalorder %s288_s20, %s288_s20 }
  0x12   :  { %v83_v14 = vsub.s32 1, %v38_v7  ;;  %v87_v15 = vsub.s32 5, %v38_v7  ;;  %v179_v16 = vsub.s32 3, %v38_v7  ;;  %v183_v17 = vsub.s32 7, %v38_v7 }
  0x13   :  { %263 = vset.pattern.permute.xlu0 %v315_v3  ;;  %265 = vset.pattern.permute.xlu1 %v316_v4  ;;  %v40_v18 = vrot.slane %v27_v10, %v39_v8  ;;  %v44_v19 = vrot.slane %v27_v10, %v43_v9  ;;  %v48_v20 = vrot.slane %v28_v11, %v39_v8  ;;  %p295_p8 = por %p294_p7, %p293_p6 }
  0x14   :  { %78 = vperm.xlu0 %263, %v29_v2   ;;  %174 = vperm.xlu1 %265, %v29_v2   ;;  %v52_v21 = vrot.slane %v28_v11, %v43_v9  ;;  %v132_v22 = vrot.slane %v27_v10, %v131_v12  ;;  %v136_v23 = vrot.slane %v27_v10, %v135_v13 }
  0x15   :  { %v140_v24 = vrot.slane %v28_v11, %v131_v12  ;;  %v144_v25 = vrot.slane %v28_v11, %v135_v13  ;;  %v84_v26 = vrot.slane %v27_v10, %v83_v14  ;;  %v88_v27 = vrot.slane %v27_v10, %v87_v15  ;;  %p296_p9 = pnand %p295_p8, %p289_p5 }
  0x16   :  { %v92_v28 = vrot.slane %v28_v11, %v83_v14  ;;  %v96_v29 = vrot.slane %v28_v11, %v87_v15  ;;  %v180_v30 = vrot.slane %v27_v10, %v179_v16  ;;  %v184_v31 = vrot.slane %v27_v10, %v183_v17 }
  0x17   :  { %v188_v32 = vrot.slane %v28_v11, %v179_v16  ;;  %v192_v33 = vrot.slane %v28_v11, %v183_v17  ;;  %v60_v35 = vrot.slane %v40_v18, %v39_v8  ;;  %v64_v36 = vrot.slane %v44_v19, %v39_v8 }
  0x18   :  { %266 = vset.pattern.permute.xlu1 %v313_v0  ;;  %267 = vset.pattern.permute.xlu0 %v313_v0  ;;  %v68_v37 = vrot.slane %v48_v20, %v39_v8  ;;  %v72_v38 = vrot.slane %v52_v21, %v39_v8  ;;  %v152_v40 = vrot.slane %v132_v22, %v131_v12 }
  0x19   :  { %224 = vperm.xlu1 %266, %v221_v5   ;;  %v156_v41 = vrot.slane %v136_v23, %v131_v12  ;;  %v160_v42 = vrot.slane %v140_v24, %v131_v12  ;;  %v164_v43 = vrot.slane %v144_v25, %v131_v12  ;;  %v104_v44 = vrot.slane %v84_v26, %v83_v14 }
  0x1a   :  { %v108_v45 = vrot.slane %v88_v27, %v83_v14  ;;  %v112_v46 = vrot.slane %v92_v28, %v83_v14  ;;  %v116_v47 = vrot.slane %v96_v29, %v83_v14  ;;  %v200_v48 = vrot.slane %v180_v30, %v179_v16 }
  0x1b   :  { %v204_v49 = vrot.slane %v184_v31, %v179_v16  ;;  %v208_v50 = vrot.slane %v188_v32, %v179_v16  ;;  %v212_v51 = vrot.slane %v192_v33, %v179_v16 }
  0x8a   :  { %v33_v34 = vpop.permute.xlu0 %32  ;;  %v127_v39 = vpop.permute.xlu1 %126 }
  0x8b   :  { %v73_v52 = vmul.f32 %v60_v35, %v33_v34  ;;  %v74_v53 = vmul.f32 %v64_v36, %v33_v34  ;;  %v75_v54 = vmul.f32 %v68_v37, %v33_v34  ;;  %v76_v55 = vmul.f32 %v72_v38, %v33_v34 }
  0x8c   :  { %v165_v56 = vmul.f32 %v152_v40, %v127_v39  ;;  %v166_v57 = vmul.f32 %v156_v41, %v127_v39  ;;  %v167_v58 = vmul.f32 %v160_v42, %v127_v39  ;;  %v168_v59 = vmul.f32 %v164_v43, %v127_v39 }
  0x8f   :  { %v79_v60 = vpop.permute.xlu0 %78  ;;  %v175_v61 = vpop.permute.xlu1 %174 }
  0x90   :  { %v117_v62 = vmul.f32 %v104_v44, %v79_v60  ;;  %v118_v63 = vmul.f32 %v108_v45, %v79_v60  ;;  %v119_v0 = vmul.f32 %v112_v46, %v79_v60  ;;  %v120_v1 = vmul.f32 %v116_v47, %v79_v60 }
  0x91   :  { %v213_v2 = vmul.f32 %v200_v48, %v175_v61  ;;  %v214_v3 = vmul.f32 %v204_v49, %v175_v61  ;;  %v215_v4 = vmul.f32 %v208_v50, %v175_v61  ;;  %v216_v5 = vmul.f32 %v212_v51, %v175_v61 }
  0x92   :  { %v121_v6 = vadd.f32 %v117_v62, %v73_v52  ;;  %v122_v7 = vadd.f32 %v118_v63, %v74_v53  ;;  %v123_v8 = vadd.f32 %v119_v0, %v75_v54  ;;  %v124_v9 = vadd.f32 %v120_v1, %v76_v55 }
  0x94   :  { %v169_v10 = vadd.f32 %v165_v56, %v121_v6  ;;  %v170_v11 = vadd.f32 %v166_v57, %v122_v7  ;;  %v171_v12 = vadd.f32 %v167_v58, %v123_v8  ;;  %v172_v13 = vadd.f32 %v168_v59, %v124_v9  ;;  %v225_v14 = vpop.permute.xlu1 %224 }
  0x96   :  { %v217_v15 = vadd.f32 %v213_v2, %v169_v10  ;;  %v218_v16 = vadd.f32 %v214_v3, %v170_v11  ;;  %v219_v17 = vadd.f32 %v215_v4, %v171_v12  ;;  %v220_v18 = vadd.f32 %v216_v5, %v172_v13 }
  0x98   :  { %v227_v19 = vadd.f32 %v225_v14, %v217_v15  ;;  %v228_v20 = vadd.f32 %v225_v14, %v218_v16  ;;  %v229_v21 = vadd.f32 %v225_v14, %v219_v17  ;;  %v230_v22 = vadd.f32 %v225_v14, %v220_v18 }
  0x9a   :  { %v235_v23 = vcombine.low %v227_v19, %v228_v20  ;;  %v236_v24 = vcombine.low %v229_v21, %v230_v22 }
  0x9c   :  { %239 = vst [vmem:[#allocation5] sm:$0xff] %v235_v23  ;;  %240 = vst [vmem:[#allocation5 + $0x8] sm:$0xff] %v236_v24 }
  0x9d   :  { %299 = shalt.err (!%p296_p9)
}
  0x9e   :  { %250 = dma.vmem_to_hbm [thread:$0]  %s248_s1, 256, %s353_s3, [#allocation4]  }
  0x9f   :  { %310 = dma.done.wait [#allocation4], 256  }
  0xa0   :  { %311 = vsyncadd [#allocation4], 4294967040 }
  0xa1   :  { %254 = vsyncpa [#allocation3], 1 }
  0xa2   :  { %255 = vsyncpa [#allocation4], 1 }

</bundles_post_ra>
